<compile_context>
chip_gen: v6e
topology: v6e:2x2x1
jax: 0.10.0
libtpu: 0.0.40
codegen_flags: <defaults>
</compile_context>

<pallas_src>
import math

import jax
import jax.numpy as jnp
from jax import lax
from jax.experimental import pallas as pl
from jax.experimental.pallas import tpu as pltpu

EPS = 1e-8
SQRT2 = math.sqrt(2.0)
LANE = 128
SUBLANE = 8

_VMEM = pl.BlockSpec(memory_space=pltpu.MemorySpace.VMEM)


def _round_up(x, m):
    return (x + m - 1) // m * m


def _gelu(x):
    # exact erf-based gelu (matches torch reference)
    return x * 0.5 * (1.0 + lax.erf(x / SQRT2))


def _l2norm_last(x):
    # torch l2norm(X, dim=-1): x / (sqrt(sum(x^2)) + eps); divide -> EUP reciprocal
    s = jnp.sum(x * x, axis=-1, keepdims=True)
    return x * pl.reciprocal(jnp.sqrt(s) + EPS, approx=True)


def _pad_cols(x, width):
    pad = width - x.shape[1]
    if pad:
        x = jnp.concatenate([x, jnp.zeros((x.shape[0], pad), x.dtype)], axis=1)
    return x


# ---------------------------------------------------------------------------
# Static dims + packed-parameter-slab layout (all Python ints, baked in kernel)
# ---------------------------------------------------------------------------
class ModelDims:
    def __init__(self, num_class, img_dim, text_dim, mid_dim, feature_dim):
        assert mid_dim % LANE == 0 and feature_dim % LANE == 0, (
            "mid_dim / feature_dim must be multiples of 128 for lane-dense packing")
        self.nc = num_class
        self.nc_pad = _round_up(num_class, LANE)     # lane-dense classifier width
        self.nc8 = _round_up(num_class, SUBLANE)
        self.img_dim = img_dim
        self.text_dim = text_dim
        self.mid = mid_dim
        self.feat = feature_dim
        self.slab_w = max(mid_dim, feature_dim)
        assert self.nc_pad <= self.slab_w
        o = 0
        self.o_iw1 = o; o += img_dim                 # img denseL1 weight [img_dim, mid]
        self.o_iw2 = o; o += mid_dim                 # img denseL2 weight [mid, feat]
        self.o_tw1 = o; o += text_dim                # text denseL1 weight [text_dim, mid]
        self.o_tw2 = o; o += mid_dim                 # text denseL2 weight [mid, feat]
        self.o_wp = o; o += self.nc_pad              # predictLayer weight, row-padded
        self.o_cen = o; o += self.nc8                # centers (stored transposed)
        self.o_bias = o; o += SUBLANE                # all biases, one aligned block
        self.slab_rows = _round_up(o, SUBLANE)
        self.out_w = max(feature_dim, self.nc_pad)


def pack_params(dims, p):
    """One-time host-side packing of all params into a single [rows, W] f32 slab."""
    W = dims.slab_w

    def block(x, rows):
        out = jnp.zeros((rows, W), jnp.float32)
        return out.at[: x.shape[0], : x.shape[1]].set(x.astype(jnp.float32))

    bias = jnp.zeros((SUBLANE, W), jnp.float32)
    bias = bias.at[0, : dims.mid].set(p["img_b1"])
    bias = bias.at[1, : dims.feat].set(p["img_b2"])
    bias = bias.at[2, : dims.mid].set(p["txt_b1"])
    bias = bias.at[3, : dims.feat].set(p["txt_b2"])
    bias = bias.at[4, : dims.nc].set(p["pred_b"])    # padded classes keep 0 bias

    blocks = [
        block(p["img_w1"], dims.img_dim),
        block(p["img_w2"], dims.mid),
        block(p["txt_w1"], dims.text_dim),
        block(p["txt_w2"], dims.mid),
        block(p["pred_w"], dims.nc_pad),             # [n_class, feat] -> [nc_pad, W]
        block(p["centers"].T, dims.nc8),             # transposed: [n_class, feat]
        bias,
    ]
    slab = jnp.concatenate(blocks, axis=0)
    if slab.shape[0] < dims.slab_rows:
        slab = jnp.concatenate(
            [slab, jnp.zeros((dims.slab_rows - slab.shape[0], W), jnp.float32)], axis=0)
    return slab


# ---------------------------------------------------------------------------
# Fused Pallas kernel
# ---------------------------------------------------------------------------
def _make_kernel(d: ModelDims):
    def kernel(img_ref, text_ref, p_ref, out_ref):
        B = img_ref.shape[0]
        ow = out_ref.shape[1]

        # all biases with one aligned [8, W] load
        biases = p_ref[d.o_bias:d.o_bias + SUBLANE, :]
        ib1, ib2 = biases[0:1, :d.mid], biases[1:2, :d.feat]
        tb1, tb2 = biases[2:3, :d.mid], biases[3:4, :d.feat]
        pb = biases[4:5, :d.nc_pad]

        # predictLayer.weight <- l2norm(w, dim=-1); zero-padded rows stay exactly 0
        wp = _l2norm_last(p_ref[d.o_wp:d.o_wp + d.nc_pad, :d.feat])     # [nc_pad, F]
        # centers stored transposed => torch l2norm(centers, dim=0) is a lane reduction
        cen_t = _l2norm_last(p_ref[d.o_cen:d.o_cen + d.nc, :d.feat])    # [nc, F]

        def branch(x, o_w1, in_dim, o_w2, b1, b2):
            w1 = p_ref[o_w1:o_w1 + in_dim, :d.mid]
            h = _gelu(jnp.dot(x, w1, preferred_element_type=jnp.float32) + b1)
            # TODO(synk): nn.Dropout is identity in eval mode; training-mode dropout not emulated.
            w2 = p_ref[o_w2:o_w2 + d.mid, :d.feat]
            f = jnp.dot(h, w2, preferred_element_type=jnp.float32) + b2
            return _l2norm_last(f)                                      # l2norm(dim=1)

        f_img = branch(img_ref[...], d.o_iw1, d.img_dim, d.o_iw2, ib1, ib2)
        f_txt = branch(text_ref[...], d.o_tw1, d.text_dim, d.o_tw2, tb1, tb2)
        f_all = jnp.concatenate([f_img, f_txt], axis=0)                 # [2B, F]

        # fused classifier head: f_all[2B,F] · wp[nc_pad,F]^T -> [2B, nc_pad] (lane-dense)
        pred = lax.dot_general(f_all, wp, (((1,), (1,)), ((), ())),
                               preferred_element_type=jnp.float32) + pb

        # consolidated lane-dense output slab: all stores are full-lane, unmasked
        out_ref[0:2 * B, :] = _pad_cols(f_all, ow)
        out_ref[2 * B:2 * B + d.nc, :] = _pad_cols(cen_t, ow)
        out_ref[2 * B + d.nc8:2 * B + d.nc8 + 2 * B, :] = _pad_cols(pred, ow)

    return kernel


# ---------------------------------------------------------------------------
# Wrapper: single pallas_call (3 input DMAs, 1 output DMA), unpack inside jit
# ---------------------------------------------------------------------------
def build_forward(num_class, img_dim, text_dim, mid_dim, feature_dim):
    dims = ModelDims(num_class, img_dim, text_dim, mid_dim, feature_dim)
    kernel = _make_kernel(dims)

    @jax.jit
    def forward(slab, img, text):
        B = img.shape[0]
        out_rows = 2 * B + dims.nc8 + 2 * B
        out = pl.pallas_call(
            kernel,
            out_shape=jax.ShapeDtypeStruct((out_rows, dims.out_w), jnp.float32),
            in_specs=[_VMEM, _VMEM, _VMEM],
            out_specs=_VMEM,
        )(img.astype(jnp.float32), text.astype(jnp.float32), slab)

        img_feat = out[0:B, :dims.feat]
        text_feat = out[B:2 * B, :dims.feat]
        centers = out[2 * B:2 * B + dims.nc, :dims.feat].T      # torch layout [feat, nc]
        pred = out[2 * B + dims.nc8:2 * B + dims.nc8 + 2 * B, :dims.nc]
        return centers, img_feat, text_feat, pred[0:B], pred[B:2 * B]

    return dims, forward


# ---------------------------------------------------------------------------
# Parameter setup (plain JAX; mirrors the torch init scheme)
# ---------------------------------------------------------------------------
def init_params(key, num_class, img_dim, text_dim, mid_dim, feature_dim):
    ks = jax.random.split(key, 12)

    def lin(k_w, k_b, fan_in, fan_out):
        bound = 1.0 / math.sqrt(fan_in)
        w = jax.random.uniform(k_w, (fan_in, fan_out), jnp.float32, -bound, bound)
        b = jax.random.uniform(k_b, (fan_out,), jnp.float32, -bound, bound)
        return w, b

    p = {}
    p["img_w1"], p["img_b1"] = lin(ks[0], ks[1], img_dim, mid_dim)
    p["img_w2"], p["img_b2"] = lin(ks[2], ks[3], mid_dim, feature_dim)
    p["txt_w1"], p["txt_b1"] = lin(ks[4], ks[5], text_dim, mid_dim)
    p["txt_w2"], p["txt_b2"] = lin(ks[6], ks[7], mid_dim, feature_dim)
    # predictLayer: torch layout [num_class, feature_dim], kaiming_normal fan_out
    std_p = math.sqrt(2.0 / num_class)
    p["pred_w"] = std_p * jax.random.normal(ks[8], (num_class, feature_dim), jnp.float32)
    bound = 1.0 / math.sqrt(feature_dim)
    p["pred_b"] = jax.random.uniform(ks[9], (num_class,), jnp.float32, -bound, bound)
    # centers: [feature_dim, num_class], kaiming_normal fan_out
    std_c = math.sqrt(2.0 / feature_dim)
    p["centers"] = std_c * jax.random.normal(ks[10], (feature_dim, num_class), jnp.float32)
    return p


def reference_forward(p, img, text):
    """Pure-JAX reference (torch semantics), used only for a sanity check."""
    def l2n(x, axis):
        return x / (jnp.sqrt(jnp.sum(x * x, axis=axis, keepdims=True)) + EPS)

    wp = l2n(p["pred_w"], -1)
    cen = l2n(p["centers"], 0)

    def branch(x, w1, b1, w2, b2):
        h = _gelu(jnp.dot(x, w1, precision=lax.Precision.HIGHEST) + b1)
        f = jnp.dot(h, w2, precision=lax.Precision.HIGHEST) + b2
        return l2n(f, -1)

    fi = branch(img, p["img_w1"], p["img_b1"], p["img_w2"], p["img_b2"])
    ft = branch(text, p["txt_w1"], p["txt_b1"], p["txt_w2"], p["txt_b2"])
    pi = jnp.dot(fi, wp.T, precision=lax.Precision.HIGHEST) + p["pred_b"]
    pt = jnp.dot(ft, wp.T, precision=lax.Precision.HIGHEST) + p["pred_b"]
    return cen, fi, ft, pi, pt


if __name__ == "__main__":
    NUM_CLASS = 16
    IMG_DIM = 256
    TEXT_DIM = 192
    MID_DIM = 128
    FEATURE_DIM = 128
    BATCH = 8

    key = jax.random.PRNGKey(0)
    k_param, k_img, k_text = jax.random.split(key, 3)

    params = init_params(k_param, NUM_CLASS, IMG_DIM, TEXT_DIM, MID_DIM, FEATURE_DIM)
    img = jax.random.normal(k_img, (BATCH, IMG_DIM), jnp.float32)
    text = jax.random.normal(k_text, (BATCH, TEXT_DIM), jnp.float32)

    dims, forward = build_forward(NUM_CLASS, IMG_DIM, TEXT_DIM, MID_DIM, FEATURE_DIM)
    slab = pack_params(dims, params)          # one-time, host-side parameter packing

    outs = forward(slab, img, text)
    jax.block_until_ready(outs)

    centers, img_features, text_features, img_pred, text_pred = outs
    assert centers.shape == (FEATURE_DIM, NUM_CLASS)
    assert img_features.shape == (BATCH, FEATURE_DIM)
    assert text_features.shape == (BATCH, FEATURE_DIM)
    assert img_pred.shape == (BATCH, NUM_CLASS)
    assert text_pred.shape == (BATCH, NUM_CLASS)

    # loose-tolerance sanity check vs pure-JAX reference (approx reciprocal + MXU rounding)
    for got, want in zip(outs, reference_forward(params, img, text)):
        assert jnp.allclose(got, want, rtol=2e-2, atol=2e-2)

    print("KERNEL_OK")
</pallas_src>

<mosaic_0001>
module attributes {stable_mosaic.version = 11 : i64} {
  func.func @kernel(%arg0: memref<8x256xf32, #tpu.memory_space<vmem>>, %arg1: memref<8x192xf32, #tpu.memory_space<vmem>>, %arg2: memref<856x128xf32, #tpu.memory_space<vmem>>, %arg3: memref<48x128xf32, #tpu.memory_space<vmem>>) attributes {dimension_semantics = [], scalar_prefetch = 0 : i64, scratch_operands = 0 : i64, tpu.core_type = #tpu.core_type<tc>} {
    %c848 = arith.constant 848 : index
    %c0 = arith.constant 0 : index
    %0 = vector.load %arg2[%c848, %c0] : memref<856x128xf32, #tpu.memory_space<vmem>>, vector<8x128xf32>
    %1 = vector.extract_strided_slice %0 {offsets = [0, 0], sizes = [1, 128], strides = [1, 1]} : vector<8x128xf32> to vector<1x128xf32>
    %2 = vector.extract_strided_slice %0 {offsets = [1, 0], sizes = [1, 128], strides = [1, 1]} : vector<8x128xf32> to vector<1x128xf32>
    %3 = vector.extract_strided_slice %0 {offsets = [2, 0], sizes = [1, 128], strides = [1, 1]} : vector<8x128xf32> to vector<1x128xf32>
    %4 = vector.extract_strided_slice %0 {offsets = [3, 0], sizes = [1, 128], strides = [1, 1]} : vector<8x128xf32> to vector<1x128xf32>
    %5 = vector.extract_strided_slice %0 {offsets = [4, 0], sizes = [1, 128], strides = [1, 1]} : vector<8x128xf32> to vector<1x128xf32>
    %c704 = arith.constant 704 : index
    %c0_0 = arith.constant 0 : index
    %6 = vector.load %arg2[%c704, %c0_0] : memref<856x128xf32, #tpu.memory_space<vmem>>, vector<128x128xf32>
    %7 = arith.mulf %6, %6 : vector<128x128xf32>
    %cst = arith.constant dense<0.000000e+00> : vector<128xf32>
    %8 = vector.multi_reduction <add>, %7, %cst [1] : vector<128x128xf32> to vector<128xf32>
    %9 = vector.shape_cast %8 : vector<128xf32> to vector<128x1xf32>
    %10 = math.sqrt %9 : vector<128x1xf32>
    %cst_1 = arith.constant 9.99999993E-9 : f32
    %11 = vector.broadcast %cst_1 : f32 to vector<128x1xf32>
    %12 = arith.addf %10, %11 : vector<128x1xf32>
    %13 = tpu.reciprocal %12 {approx = true} : vector<128x1xf32> -> vector<128x1xf32>
    %14 = vector.broadcast %13 : vector<128x1xf32> to vector<128x128xf32>
    %15 = arith.mulf %6, %14 : vector<128x128xf32>
    %c832 = arith.constant 832 : index
    %c0_2 = arith.constant 0 : index
    %16 = vector.load %arg2[%c832, %c0_2] : memref<856x128xf32, #tpu.memory_space<vmem>>, vector<16x128xf32>
    %17 = arith.mulf %16, %16 : vector<16x128xf32>
    %cst_3 = arith.constant dense<0.000000e+00> : vector<16xf32>
    %18 = vector.multi_reduction <add>, %17, %cst_3 [1] : vector<16x128xf32> to vector<16xf32>
    %19 = vector.shape_cast %18 : vector<16xf32> to vector<16x1xf32>
    %20 = math.sqrt %19 : vector<16x1xf32>
    %cst_4 = arith.constant 9.99999993E-9 : f32
    %21 = vector.broadcast %cst_4 : f32 to vector<16x1xf32>
    %22 = arith.addf %20, %21 : vector<16x1xf32>
    %23 = tpu.reciprocal %22 {approx = true} : vector<16x1xf32> -> vector<16x1xf32>
    %24 = vector.broadcast %23 : vector<16x1xf32> to vector<16x128xf32>
    %25 = arith.mulf %16, %24 : vector<16x128xf32>
    %c0_5 = arith.constant 0 : index
    %c0_6 = arith.constant 0 : index
    %26 = vector.load %arg0[%c0_5, %c0_6] : memref<8x256xf32, #tpu.memory_space<vmem>>, vector<8x256xf32>
    %c0_7 = arith.constant 0 : index
    %c0_8 = arith.constant 0 : index
    %27 = vector.load %arg2[%c0_7, %c0_8] : memref<856x128xf32, #tpu.memory_space<vmem>>, vector<256x128xf32>
    %cst_9 = arith.constant dense<0.000000e+00> : vector<8x128xf32>
    %28 = tpu.matmul %26, %27, %cst_9 {dimension_numbers = #tpu.dot_dimension_numbers<[1], [0], [0], [1], [0, 0, 1, 1], [], []>} : vector<8x256xf32>, vector<256x128xf32>, vector<8x128xf32> -> vector<8x128xf32>
    %29 = vector.broadcast %1 : vector<1x128xf32> to vector<8x128xf32>
    %30 = arith.addf %28, %29 : vector<8x128xf32>
    %cst_10 = arith.constant 5.000000e-01 : f32
    %31 = vector.broadcast %cst_10 : f32 to vector<8x128xf32>
    %32 = arith.mulf %30, %31 : vector<8x128xf32>
    %cst_11 = arith.constant 1.41421354 : f32
    %33 = vector.broadcast %cst_11 : f32 to vector<8x128xf32>
    %34 = arith.divf %30, %33 : vector<8x128xf32>
    %35 = math.erf %34 : vector<8x128xf32>
    %cst_12 = arith.constant 1.000000e+00 : f32
    %36 = vector.broadcast %cst_12 : f32 to vector<8x128xf32>
    %37 = arith.addf %36, %35 : vector<8x128xf32>
    %38 = arith.mulf %32, %37 : vector<8x128xf32>
    %c256 = arith.constant 256 : index
    %c0_13 = arith.constant 0 : index
    %39 = vector.load %arg2[%c256, %c0_13] : memref<856x128xf32, #tpu.memory_space<vmem>>, vector<128x128xf32>
    %cst_14 = arith.constant dense<0.000000e+00> : vector<8x128xf32>
    %40 = tpu.matmul %38, %39, %cst_14 {dimension_numbers = #tpu.dot_dimension_numbers<[1], [0], [0], [1], [0, 0, 1, 1], [], []>} : vector<8x128xf32>, vector<128x128xf32>, vector<8x128xf32> -> vector<8x128xf32>
    %41 = vector.broadcast %2 : vector<1x128xf32> to vector<8x128xf32>
    %42 = arith.addf %40, %41 : vector<8x128xf32>
    %43 = arith.mulf %42, %42 : vector<8x128xf32>
    %cst_15 = arith.constant dense<0.000000e+00> : vector<8xf32>
    %44 = vector.multi_reduction <add>, %43, %cst_15 [1] : vector<8x128xf32> to vector<8xf32>
    %45 = vector.shape_cast %44 : vector<8xf32> to vector<8x1xf32>
    %46 = math.sqrt %45 : vector<8x1xf32>
    %cst_16 = arith.constant 9.99999993E-9 : f32
    %47 = vector.broadcast %cst_16 : f32 to vector<8x1xf32>
    %48 = arith.addf %46, %47 : vector<8x1xf32>
    %49 = tpu.reciprocal %48 {approx = true} : vector<8x1xf32> -> vector<8x1xf32>
    %50 = vector.broadcast %49 : vector<8x1xf32> to vector<8x128xf32>
    %51 = arith.mulf %42, %50 : vector<8x128xf32>
    %c0_17 = arith.constant 0 : index
    %c0_18 = arith.constant 0 : index
    %52 = vector.load %arg1[%c0_17, %c0_18] : memref<8x192xf32, #tpu.memory_space<vmem>>, vector<8x192xf32>
    %c384 = arith.constant 384 : index
    %c0_19 = arith.constant 0 : index
    %53 = vector.load %arg2[%c384, %c0_19] : memref<856x128xf32, #tpu.memory_space<vmem>>, vector<192x128xf32>
    %cst_20 = arith.constant dense<0.000000e+00> : vector<8x128xf32>
    %54 = tpu.matmul %52, %53, %cst_20 {dimension_numbers = #tpu.dot_dimension_numbers<[1], [0], [0], [1], [0, 0, 1, 1], [], []>} : vector<8x192xf32>, vector<192x128xf32>, vector<8x128xf32> -> vector<8x128xf32>
    %55 = vector.broadcast %3 : vector<1x128xf32> to vector<8x128xf32>
    %56 = arith.addf %54, %55 : vector<8x128xf32>
    %cst_21 = arith.constant 5.000000e-01 : f32
    %57 = vector.broadcast %cst_21 : f32 to vector<8x128xf32>
    %58 = arith.mulf %56, %57 : vector<8x128xf32>
    %cst_22 = arith.constant 1.41421354 : f32
    %59 = vector.broadcast %cst_22 : f32 to vector<8x128xf32>
    %60 = arith.divf %56, %59 : vector<8x128xf32>
    %61 = math.erf %60 : vector<8x128xf32>
    %cst_23 = arith.constant 1.000000e+00 : f32
    %62 = vector.broadcast %cst_23 : f32 to vector<8x128xf32>
    %63 = arith.addf %62, %61 : vector<8x128xf32>
    %64 = arith.mulf %58, %63 : vector<8x128xf32>
    %c576 = arith.constant 576 : index
    %c0_24 = arith.constant 0 : index
    %65 = vector.load %arg2[%c576, %c0_24] : memref<856x128xf32, #tpu.memory_space<vmem>>, vector<128x128xf32>
    %cst_25 = arith.constant dense<0.000000e+00> : vector<8x128xf32>
    %66 = tpu.matmul %64, %65, %cst_25 {dimension_numbers = #tpu.dot_dimension_numbers<[1], [0], [0], [1], [0, 0, 1, 1], [], []>} : vector<8x128xf32>, vector<128x128xf32>, vector<8x128xf32> -> vector<8x128xf32>
    %67 = vector.broadcast %4 : vector<1x128xf32> to vector<8x128xf32>
    %68 = arith.addf %66, %67 : vector<8x128xf32>
    %69 = arith.mulf %68, %68 : vector<8x128xf32>
    %cst_26 = arith.constant dense<0.000000e+00> : vector<8xf32>
    %70 = vector.multi_reduction <add>, %69, %cst_26 [1] : vector<8x128xf32> to vector<8xf32>
    %71 = vector.shape_cast %70 : vector<8xf32> to vector<8x1xf32>
    %72 = math.sqrt %71 : vector<8x1xf32>
    %cst_27 = arith.constant 9.99999993E-9 : f32
    %73 = vector.broadcast %cst_27 : f32 to vector<8x1xf32>
    %74 = arith.addf %72, %73 : vector<8x1xf32>
    %75 = tpu.reciprocal %74 {approx = true} : vector<8x1xf32> -> vector<8x1xf32>
    %76 = vector.broadcast %75 : vector<8x1xf32> to vector<8x128xf32>
    %77 = arith.mulf %68, %76 : vector<8x128xf32>
    %78 = tpu.concatenate %51, %77 in 0 : vector<8x128xf32>, vector<8x128xf32> -> vector<16x128xf32>
    %cst_28 = arith.constant dense<0.000000e+00> : vector<16x128xf32>
    %79 = tpu.matmul %78, %15, %cst_28 {dimension_numbers = #tpu.dot_dimension_numbers<[1], [1], [0], [0], [0, 0, 1, 0], [], []>} : vector<16x128xf32>, vector<128x128xf32>, vector<16x128xf32> -> vector<16x128xf32>
    %80 = vector.broadcast %5 : vector<1x128xf32> to vector<16x128xf32>
    %81 = arith.addf %79, %80 : vector<16x128xf32>
    %c0_29 = arith.constant 0 : index
    %c0_30 = arith.constant 0 : index
    %82 = vector.load %arg3[%c0_29, %c0_30] : memref<48x128xf32, #tpu.memory_space<vmem>>, vector<16x128xf32>
    tpu.vector_store %arg3[%c0_29, %c0_30], %78 {strides = array<i32>} : memref<48x128xf32, #tpu.memory_space<vmem>>, vector<16x128xf32>,
    %c16 = arith.constant 16 : index
    %c0_31 = arith.constant 0 : index
    %83 = vector.load %arg3[%c16, %c0_31] : memref<48x128xf32, #tpu.memory_space<vmem>>, vector<16x128xf32>
    tpu.vector_store %arg3[%c16, %c0_31], %25 {strides = array<i32>} : memref<48x128xf32, #tpu.memory_space<vmem>>, vector<16x128xf32>,
    %c32 = arith.constant 32 : index
    %c0_32 = arith.constant 0 : index
    %84 = vector.load %arg3[%c32, %c0_32] : memref<48x128xf32, #tpu.memory_space<vmem>>, vector<16x128xf32>
    tpu.vector_store %arg3[%c32, %c0_32], %81 {strides = array<i32>} : memref<48x128xf32, #tpu.memory_space<vmem>>, vector<16x128xf32>,
    return
  }
}

</mosaic_0001>

<bundles_post_ra>
// kernel: forward.1
= control target key start
LH: loop header
LB: loop body
LE: loop exit
PB: predicated region body
PF: predicated region fallthrough
CT: control target
= control target key end

     0   :  { %8 = vsyncpa [#allocation3], 0  ;;  %s1463_s0 = inlined_call_operand.hbm [shape: f32[8,256], index: 0, kind: input, shape index: {}]   ;;  %s1464_s1 = inlined_call_operand.hbm [shape: f32[8,192], index: 1, kind: input, shape index: {}]   ;;  %s1465_s2 = inlined_call_operand.hbm [shape: f32[856,128], index: 2, kind: input, shape index: {}]   ;;  %s1466_s3 = inlined_call_operand.vmem [shape: f32[48,128], index: 3, kind: output, shape index: {}]  }
   0x1   :  { %9 = vsyncpa [#allocation5], 0  ;;  %s1172_s12 = smov [#allocation4]   ;;  %s1173_s14 = smov [#allocation2]  }
   0x2   :  { %s26_s13 = sshll.u32 %s1172_s12, 4  ;;  %s16_s15 = sshll.u32 %s1173_s14, 4  ;;  %s27_s13 = int_to_ptr.vmem [resolvable:$true] %s26_s13  ;;  %s17_s15 = int_to_ptr.vmem [resolvable:$true] %s16_s15 }
   0x3   :  { %s1116_s16 = scalar_lea.vmem %s27_s13, 256  ;;  %p1121_p1 = scmp.lt.s32.totalorder %s27_s13, %s27_s13 }
   0x4   :  { %p1117_p0 = scmp.ne.s32.totalorder %s27_s13, %s1116_s16  ;;  %p1122_p2 = scmp.lt.s32.totalorder %s1116_s16, %s1116_s16 }
   0x6   :  { %p1123_p3 = por %p1122_p2, %p1121_p1 }
   0x8   :  { %p1124_p4 = pnand %p1123_p3, %p1117_p0 }
   0xa   :  { %1127 = shalt.err (!%p1124_p4)
}
   0xb   :  { %29 = dma.hbm_to_vmem [thread:$0]  %s1464_s1, 256, %s27_s13, [#allocation5]  }
   0xc   :  { %s1136_s19 = scalar_lea.vmem %s17_s15, 256  ;;  %p1141_p6 = scmp.lt.s32.totalorder %s17_s15, %s17_s15 }
   0xd   :  { %p1137_p5 = scmp.ne.s32.totalorder %s17_s15, %s1136_s19  ;;  %p1142_p7 = scmp.lt.s32.totalorder %s1136_s19, %s1136_s19 }
   0xf   :  { %p1143_p8 = por %p1142_p7, %p1141_p6 }
  0x11   :  { %p1144_p9 = pnand %p1143_p8, %p1137_p5 }
  0x13   :  { %1147 = shalt.err (!%p1144_p9)
}
  0x14   :  { %19 = dma.hbm_to_vmem [thread:$0]  %s1463_s0, 256, %s17_s15, [#allocation3]  }
  0x15   :  { %s1174_s22 = smov [#allocation6]  }
  0x16   :  { %s35_s23 = sshll.u32 %s1174_s22, 4  ;;  %s36_s23 = int_to_ptr.vmem [resolvable:$true] %s35_s23 }
  0x17   :  { %s1156_s24 = scalar_lea.vmem %s36_s23, 13696  ;;  %p1161_p11 = scmp.lt.s32.totalorder %s36_s23, %s36_s23 }
  0x18   :  { %p1157_p10 = scmp.ne.s32.totalorder %s36_s23, %s1156_s24  ;;  %p1162_p12 = scmp.lt.s32.totalorder %s1156_s24, %s1156_s24 }
  0x1a   :  { %p1163_p13 = por %p1162_p12, %p1161_p11 }
  0x1c   :  { %p1164_p0 = pnand %p1163_p13, %p1157_p10 }
  0x1e   :  { %1167 = shalt.err (!%p1164_p0)
}
  0x1f   :  { %s1175_s1 = smov 128   ;;  %s1176_s25 = smov 8  }
  0x20   :  { %41 = dma.hbm_to_vmem [thread:$0]  %s1465_s2, 13696, %s36_s23, [#allocation5], %s1175_s1, %s1175_s1, %s1176_s25  }
  0x21   :  { %1168 = dma.done.wait [#allocation3], 256  }
  0x22   :  { %1169 = vsyncadd [#allocation3], 4294967040 }
  0x23   :  { %1170 = dma.done.wait [#allocation5], 13952  }
  0x24   :  { %1171 = vsyncadd [#allocation5], 4294953344  ;;  %v1177_v0 = vmov 0.0   ;;  %v337_v1 = vld [vmem:[#allocation6 + $0xf8] sm:$0xff]  ;;  %v336_v3 = vld [vmem:[#allocation6 + $0xf0] sm:$0xff]  ;;  %vm1178_vm0 = vmmov 0  }
  0x25   :  { %947 = vmatprep.subr.mxu1 %v1177_v0  ;;  %v321_v2 = vld [vmem:[#allocation6 + $0x78] sm:$0xff]  ;;  %825 = vmatprep.subr.mxu0 %v337_v1  ;;  %v320_v4 = vld [vmem:[#allocation6 + $0x70] sm:$0xff]  ;;  %v335_v5 = vld [vmem:[#allocation6 + $0xe8] sm:$0xff]  ;;  %vm551_vm1 = vcmask 523264  }
  0x26   :  { %826 = vmatpush3.msra.mxu0 %v321_v2  ;;  %v319_v6 = vld [vmem:[#allocation6 + $0x68] sm:$0xff]  ;;  %v334_v7 = vld [vmem:[#allocation6 + $0xe0] sm:$0xff]  ;;  %v333_v9 = vld [vmem:[#allocation6 + $0xd8] sm:$0xff]  ;;  %979 = vmatprep.mubr.msk.f32.mxu1 %vm1178_vm0, %v1177_v0  ;;  %v338_v2 = vlaneseq }
  0x27   :  { %827 = vmatprep.subr.mxu0 %v336_v3  ;;  %v318_v8 = vld [vmem:[#allocation6 + $0x60] sm:$0xff]  ;;  %v317_v10 = vld [vmem:[#allocation6 + $0x58] sm:$0xff]  ;;  %v332_v11 = vld [vmem:[#allocation6 + $0xd0] sm:$0xff] }
  0x28   :  { %828 = vmatpush3.msra.mxu0 %v320_v4  ;;  %v316_v12 = vld [vmem:[#allocation6 + $0x50] sm:$0xff]  ;;  %v331_v13 = vld [vmem:[#allocation6 + $0xc8] sm:$0xff]  ;;  %v330_v16 = vld [vmem:[#allocation6 + $0xc0] sm:$0xff]  ;;  %v1256_v3 = vshrl.u32 %v338_v2, 7 }
  0x29   :  { %829 = vmatprep.subr.mxu0 %v335_v5  ;;  %v305_v14 = vld [vmem:[#allocation2 + $0x8] sm:$0xff]  ;;  %v314_v17 = vld [vmem:[#allocation6 + $0x40] sm:$0xff]  ;;  %v329_v18 = vld [vmem:[#allocation6 + $0xb8] sm:$0xff] }
  0x2a   :  { %830 = vmatpush3.msra.mxu0 %v319_v6  ;;  %v315_v15 = vld [vmem:[#allocation6 + $0x48] sm:$0xff]  ;;  %406 = vmatprep.mubr.f32.mxu0 %v305_v14  ;;  %v313_v19 = vld [vmem:[#allocation6 + $0x38] sm:$0xff]  ;;  %v328_v20 = vld [vmem:[#allocation6 + $0xb0] sm:$0xff]  ;;  %v340_v4 = vsub.s32 0, %v1256_v3 }
  0x2b   :  { %831 = vmatprep.subr.mxu0 %v334_v7  ;;  %v312_v21 = vld [vmem:[#allocation6 + $0x30] sm:$0xff]  ;;  %v327_v22 = vld [vmem:[#allocation6 + $0xa8] sm:$0xff]  ;;  %v326_v24 = vld [vmem:[#allocation6 + $0xa0] sm:$0xff] }
  0x2c   :  { %832 = vmatpush3.msra.mxu0 %v318_v8  ;;  %v311_v23 = vld [vmem:[#allocation6 + $0x28] sm:$0xff]  ;;  %v310_v25 = vld [vmem:[#allocation6 + $0x20] sm:$0xff]  ;;  %v325_v26 = vld [vmem:[#allocation6 + $0x98] sm:$0xff] }
  0x2d   :  { %833 = vmatprep.subr.mxu0 %v333_v9  ;;  %v309_v27 = vld [vmem:[#allocation6 + $0x18] sm:$0xff]  ;;  %v324_v28 = vld [vmem:[#allocation6 + $0x90] sm:$0xff]  ;;  %v323_v30 = vld [vmem:[#allocation6 + $0x88] sm:$0xff] }
  0x2e   :  { %834 = vmatpush3.msra.mxu0 %v317_v10  ;;  %v308_v29 = vld [vmem:[#allocation6 + $0x10] sm:$0xff]  ;;  %v307_v31 = vld [vmem:[#allocation6 + $0x8] sm:$0xff]  ;;  %v322_v32 = vld [vmem:[#allocation6 + $0x80] sm:$0xff] }
  0x2f   :  { %835 = vmatprep.subr.mxu0 %v332_v11  ;;  %v306_v33 = vld [vmem:[#allocation6] sm:$0xff]  ;;  %v433_v35 = vld [vmem:[#allocation6 + $0x178] sm:$0xff]  ;;  %v432_v36 = vld [vmem:[#allocation6 + $0x170] sm:$0xff] }
  0x30   :  { %836 = vmatpush3.msra.mxu0 %v316_v12  ;;  %v304_v34 = vld [vmem:[#allocation2] sm:$0xff]  ;;  %v431_v37 = vld [vmem:[#allocation6 + $0x168] sm:$0xff]  ;;  %v429_v39 = vld [vmem:[#allocation6 + $0x158] sm:$0xff] }
  0x31   :  { %837 = vmatprep.subr.mxu0 %v331_v13  ;;  %v430_v38 = vld [vmem:[#allocation6 + $0x160] sm:$0xff]  ;;  %v428_v40 = vld [vmem:[#allocation6 + $0x150] sm:$0xff]  ;;  %v427_v41 = vld [vmem:[#allocation6 + $0x148] sm:$0xff] }
  0x32   :  { %838 = vmatpush3.msra.mxu0 %v315_v15  ;;  %v426_v42 = vld [vmem:[#allocation6 + $0x140] sm:$0xff]  ;;  %v425_v43 = vld [vmem:[#allocation6 + $0x138] sm:$0xff]  ;;  %v424_v44 = vld [vmem:[#allocation6 + $0x130] sm:$0xff] }
  0x33   :  { %839 = vmatprep.subr.mxu0 %v330_v16  ;;  %v423_v45 = vld [vmem:[#allocation6 + $0x128] sm:$0xff]  ;;  %v422_v46 = vld [vmem:[#allocation6 + $0x120] sm:$0xff]  ;;  %v421_v47 = vld [vmem:[#allocation6 + $0x118] sm:$0xff] }
  0x34   :  { %840 = vmatpush3.msra.mxu0 %v314_v17  ;;  %v420_v48 = vld [vmem:[#allocation6 + $0x110] sm:$0xff]  ;;  %v419_v49 = vld [vmem:[#allocation6 + $0x108] sm:$0xff]  ;;  %v418_v50 = vld [vmem:[#allocation6 + $0x100] sm:$0xff] }
  0x35   :  { %841 = vmatprep.subr.mxu0 %v329_v18  ;;  %v1228_v51 = vld [vmem:[#allocation6 + $0x338] sm:$0xff]  ;;  %v1230_v52 = vld [vmem:[#allocation6 + $0x330] sm:$0xff]  ;;  %v1240_v57 = vld [vmem:[#allocation6 + $0x308] sm:$0xff] }
  0x36   :  { %842 = vmatpush3.msra.mxu0 %v313_v19  ;;  %v83_v53 = vmul.f32 %v1228_v51, %v1228_v51  ;;  %v82_v54 = vmul.f32 %v1230_v52, %v1230_v52  ;;  %v1236_v55 = vld [vmem:[#allocation6 + $0x318] sm:$0xff]  ;;  %v77_v58 = vmul.f32 %v1240_v57, %v1240_v57  ;;  %v1248_v61 = vld [vmem:[#allocation6 + $0x2e8] sm:$0xff]  ;;  %v1259_v5 = vld [vmem:[#allocation6 + $0x350] sm:$0xff] }
  0x37   :  { %843 = vmatprep.subr.mxu0 %v328_v20  ;;  %v79_v56 = vmul.f32 %v1236_v55, %v1236_v55  ;;  %v1244_v59 = vld [vmem:[#allocation6 + $0x2f8] sm:$0xff]  ;;  %v73_v62 = vmul.f32 %v1248_v61, %v1248_v61  ;;  %v341_v7 = vrot.slane %v1259_v5, %v340_v4  ;;  %v537_v18 = vld [vmem:[#allocation6 + $0x1f0] sm:$0xff]  ;;  %v536_v19 = vld [vmem:[#allocation6 + $0x1e8] sm:$0xff] }
  0x38   :  { %844 = vmatpush3.msra.mxu0 %v312_v21  ;;  %114 = vadd.xlane.f32.xlu0 %v83_v53  ;;  %v75_v60 = vmul.f32 %v1244_v59, %v1244_v59  ;;  %v1252_v63 = vld [vmem:[#allocation6 + $0x2d8] sm:$0xff]  ;;  %v535_v20 = vld [vmem:[#allocation6 + $0x1e0] sm:$0xff]  ;;  %v631_v2 = vld [vmem:[#allocation6 + $0x248] sm:$0xff] }
  0x39   :  { %845 = vmatprep.subr.mxu0 %v327_v22  ;;  %v71_v1 = vmul.f32 %v1252_v63, %v1252_v63  ;;  %v538_v16 = vld [vmem:[#allocation6 + $0x1f8] sm:$0xff]  ;;  %v533_v22 = vld [vmem:[#allocation6 + $0x1d0] sm:$0xff]  ;;  %v638_v53 = vld [vmem:[#allocation6 + $0x280] sm:$0xff] }
  0x3a   :  { %846 = vmatpush3.msra.mxu0 %v311_v23  ;;  %v522_v17 = vld [vmem:[#allocation4 + $0x8] sm:$0xff]  ;;  %v532_v23 = vld [vmem:[#allocation6 + $0x1c8] sm:$0xff]  ;;  %v630_v4 = vld [vmem:[#allocation6 + $0x240] sm:$0xff] }
  0x3b   :  { %847 = vmatprep.subr.mxu0 %v326_v24  ;;  %v534_v21 = vld [vmem:[#allocation6 + $0x1d8] sm:$0xff]  ;;  %v531_v24 = vld [vmem:[#allocation6 + $0x1c0] sm:$0xff] }
  0x3c   :  { %848 = vmatpush3.msra.mxu0 %v310_v25  ;;  %112 = vadd.xlane.f32.xlu0 %v82_v54  ;;  %v530_v25 = vld [vmem:[#allocation6 + $0x1b8] sm:$0xff] }
  0x3d   :  { %849 = vmatprep.subr.mxu0 %v325_v26  ;;  %v529_v26 = vld [vmem:[#allocation6 + $0x1b0] sm:$0xff]  ;;  %v637_v54 = vld [vmem:[#allocation6 + $0x278] sm:$0xff] }
  0x3e   :  { %850 = vmatpush3.msra.mxu0 %v309_v27  ;;  %v528_v27 = vld [vmem:[#allocation6 + $0x1a8] sm:$0xff] }
  0x3f   :  { %851 = vmatprep.subr.mxu0 %v324_v28  ;;  %v527_v28 = vld [vmem:[#allocation6 + $0x1a0] sm:$0xff] }
  0x40   :  { %852 = vmatpush3.msra.mxu0 %v308_v29  ;;  %106 = vadd.xlane.f32.xlu0 %v79_v56  ;;  %v526_v29 = vld [vmem:[#allocation6 + $0x198] sm:$0xff]  ;;  %v636_v56 = vld [vmem:[#allocation6 + $0x270] sm:$0xff] }
  0x41   :  { %853 = vmatprep.subr.mxu0 %v323_v30  ;;  %v525_v30 = vld [vmem:[#allocation6 + $0x190] sm:$0xff] }
  0x42   :  { %854 = vmatpush3.msra.mxu0 %v307_v31  ;;  %v524_v31 = vld [vmem:[#allocation6 + $0x188] sm:$0xff] }
  0x43   :  { %855 = vmatprep.subr.mxu0 %v322_v32  ;;  %v523_v32 = vld [vmem:[#allocation6 + $0x180] sm:$0xff] }
  0x44   :  { %856 = vmatpush3.msra.mxu0 %v306_v33  ;;  %102 = vadd.xlane.f32.xlu0 %v77_v58  ;;  %v546_v33 = vld [vmem:[#allocation6 + $0x238] sm:$0xff]  ;;  %v635_v58 = vld [vmem:[#allocation6 + $0x268] sm:$0xff] }
  0x45   :  { %407 = vmatmul.mubr.f32.vlgmr.msra.gmra.mxu0 %v304_v34  ;;  %912 = vmatprep.subr.mxu0 %v1177_v0  ;;  %v545_v34 = vld [vmem:[#allocation6 + $0x230] sm:$0xff] }
  0x46   :  { %913 = vmatpush3.msra.mxu0 %v433_v35  ;;  %944 = vmatprep.mubr.msk.f32.mxu0 %vm1178_vm0, %v1177_v0  ;;  %v544_v35 = vld [vmem:[#allocation6 + $0x228] sm:$0xff] }
  0x47   :  { %914 = vmatprep.subr.mxu0 %v1177_v0 }
  0x48   :  { %915 = vmatpush3.msra.mxu0 %v432_v36  ;;  %98 = vadd.xlane.f32.xlu0 %v75_v60  ;;  %v543_v36 = vld [vmem:[#allocation6 + $0x220] sm:$0xff] }
  0x49   :  { %916 = vmatprep.subr.mxu0 %v1177_v0  ;;  %v634_v60 = vld [vmem:[#allocation6 + $0x260] sm:$0xff] }
  0x4a   :  { %917 = vmatpush3.msra.mxu0 %v431_v37  ;;  %v542_v37 = vld [vmem:[#allocation6 + $0x218] sm:$0xff] }
  0x4b   :  { %918 = vmatprep.subr.mxu0 %v1177_v0 }
  0x4c   :  { %919 = vmatpush3.msra.mxu0 %v430_v38  ;;  %94 = vadd.xlane.f32.xlu0 %v73_v62  ;;  %v541_v38 = vld [vmem:[#allocation6 + $0x210] sm:$0xff]  ;;  %v633_v62 = vld [vmem:[#allocation6 + $0x258] sm:$0xff] }
  0x4d   :  { %920 = vmatprep.subr.mxu0 %v1177_v0 }
  0x4e   :  { %921 = vmatpush3.msra.mxu0 %v429_v39  ;;  %v540_v39 = vld [vmem:[#allocation6 + $0x208] sm:$0xff] }
  0x4f   :  { %922 = vmatprep.subr.mxu0 %v1177_v0 }
  0x50   :  { %923 = vmatpush3.msra.mxu0 %v428_v40  ;;  %90 = vadd.xlane.f32.xlu0 %v71_v1  ;;  %v539_v40 = vld [vmem:[#allocation6 + $0x200] sm:$0xff]  ;;  %v632_v1 = vld [vmem:[#allocation6 + $0x250] sm:$0xff] }
  0x51   :  { %924 = vmatprep.subr.mxu0 %v1177_v0 }
  0x52   :  { %925 = vmatpush3.msra.mxu0 %v427_v41  ;;  %v521_v41 = vld [vmem:[#allocation4] sm:$0xff] }
  0x53   :  { %926 = vmatprep.subr.mxu0 %v1177_v0 }
  0x54   :  { %927 = vmatpush3.msra.mxu0 %v426_v42  ;;  %v1285_v42 = vld [vmem:[#allocation6 + $0x2c8] sm:$0xff] }
  0x55   :  { %928 = vmatprep.subr.mxu0 %v1177_v0 }
  0x56   :  { %929 = vmatpush3.msra.mxu0 %v425_v43  ;;  %v69_v43 = vmul.f32 %v1285_v42, %v1285_v42 }
  0x57   :  { %930 = vmatprep.subr.mxu0 %v1177_v0 }
  0x58   :  { %931 = vmatpush3.msra.mxu0 %v424_v44  ;;  %86 = vadd.xlane.f32.xlu0 %v69_v43  ;;  %v645_v44 = vld [vmem:[#allocation6 + $0x2b8] sm:$0xff] }
  0x59   :  { %932 = vmatprep.subr.mxu0 %v1177_v0  ;;  %948 = vmatpush3.msra.mxu1 %v645_v44 }
  0x5a   :  { %933 = vmatpush3.msra.mxu0 %v423_v45  ;;  %v644_v45 = vld [vmem:[#allocation6 + $0x2b0] sm:$0xff]  ;;  %949 = vmatprep.subr.mxu1 %v1177_v0 }
  0x5b   :  { %934 = vmatprep.subr.mxu0 %v1177_v0  ;;  %950 = vmatpush3.msra.mxu1 %v644_v45 }
  0x5c   :  { %935 = vmatpush3.msra.mxu0 %v422_v46  ;;  %v643_v46 = vld [vmem:[#allocation6 + $0x2a8] sm:$0xff]  ;;  %951 = vmatprep.subr.mxu1 %v1177_v0 }
  0x5d   :  { %936 = vmatprep.subr.mxu0 %v1177_v0  ;;  %952 = vmatpush3.msra.mxu1 %v643_v46 }
  0x5e   :  { %937 = vmatpush3.msra.mxu0 %v421_v47  ;;  %v642_v47 = vld [vmem:[#allocation6 + $0x2a0] sm:$0xff]  ;;  %953 = vmatprep.subr.mxu1 %v1177_v0 }
  0x5f   :  { %938 = vmatprep.subr.mxu0 %v1177_v0  ;;  %954 = vmatpush3.msra.mxu1 %v642_v47 }
  0x60   :  { %939 = vmatpush3.msra.mxu0 %v420_v48  ;;  %955 = vmatprep.subr.mxu1 %v1177_v0  ;;  %v641_v48 = vld [vmem:[#allocation6 + $0x298] sm:$0xff] }
  0x61   :  { %940 = vmatprep.subr.mxu0 %v1177_v0  ;;  %956 = vmatpush3.msra.mxu1 %v641_v48 }
  0x62   :  { %941 = vmatpush3.msra.mxu0 %v419_v49  ;;  %957 = vmatprep.subr.mxu1 %v1177_v0  ;;  %v640_v49 = vld [vmem:[#allocation6 + $0x290] sm:$0xff] }
  0x63   :  { %942 = vmatprep.subr.mxu0 %v1177_v0  ;;  %958 = vmatpush3.msra.mxu1 %v640_v49 }
  0x64   :  { %943 = vmatpush3.msra.mxu0 %v418_v50  ;;  %959 = vmatprep.subr.mxu1 %v1177_v0  ;;  %v639_v50 = vld [vmem:[#allocation6 + $0x288] sm:$0xff] }
  0x65   :  { %555 = vmatprep.subr.mxu0 %v1177_v0  ;;  %960 = vmatpush3.msra.mxu1 %v639_v50 }
  0x66   :  { %961 = vmatprep.subr.mxu1 %v1177_v0 }
  0x67   :  { %962 = vmatpush3.msra.mxu1 %v638_v53 }
  0x68   :  { %963 = vmatprep.subr.mxu1 %v1177_v0 }
  0x69   :  { %964 = vmatpush3.msra.mxu1 %v637_v54 }
  0x6a   :  { %965 = vmatprep.subr.mxu1 %v1177_v0 }
  0x6b   :  { %966 = vmatpush3.msra.mxu1 %v636_v56 }
  0x6c   :  { %967 = vmatprep.subr.mxu1 %v1177_v0 }
  0x6d   :  { %968 = vmatpush3.msra.mxu1 %v635_v58 }
  0x6e   :  { %969 = vmatprep.subr.mxu1 %v1177_v0 }
  0x6f   :  { %970 = vmatpush3.msra.mxu1 %v634_v60 }
  0x70   :  { %971 = vmatprep.subr.mxu1 %v1177_v0 }
  0x71   :  { %972 = vmatpush3.msra.mxu1 %v633_v62 }
  0x72   :  { %973 = vmatprep.subr.mxu1 %v1177_v0 }
  0x73   :  { %974 = vmatpush3.msra.mxu1 %v632_v1 }
  0x74   :  { %975 = vmatprep.subr.mxu1 %v1177_v0 }
  0x75   :  { %976 = vmatpush3.msra.mxu1 %v631_v2 }
  0x76   :  { %977 = vmatprep.subr.mxu1 %v1177_v0 }
  0x77   :  { %978 = vmatpush3.msra.mxu1 %v630_v4 }
 0x105   :  { %v857_v6 = vpop.f32.mrf.mxu0 }
 0x107   :  { %v858_v8 = vpop.f32.mrf.mxu0 }
 0x108   :  { %v859_v9 = vadd.f32 %v858_v8, %v857_v6  ;;  %v436_v6 = vsub.s32 1, %v1256_v3 }
 0x10a   :  { %v409_v10 = vadd.f32 %v859_v9, %v341_v7  ;;  %v437_v7 = vrot.slane %v1259_v5, %v436_v6 }
 0x10c   :  { %v414_v11 = vmul.f32 0.70710677, %v409_v10  ;;  %v412_v13 = vmul.f32 0.5, %v409_v10 }
 0x10e   :  { %1024 = verf.f32 %v414_v11 }
 0x11b   :  { %v1025_v12 = vpop.eup %1024 }
 0x11c   :  { %v416_v14 = vadd.f32 1.0, %v1025_v12  ;;  %v549_v12 = vsub.s32 2, %v1256_v3 }
 0x11e   :  { %v417_v15 = vmul.f32 %v416_v14, %v412_v13  ;;  %v550_v13 = vrot.slane %v1259_v5, %v549_v12 }
 0x120   :  { %945 = vmatmul.mubr.f32.vlgmr.msra.gmra.mxu0 %v417_v15 }
 0x121   :  { %556 = vmatpush1.msra.mxu0 %v538_v16  ;;  %824 = vmatprep.mubr.msk.f32.mxu0 %vm551_vm1, %v522_v17  ;;  %v1312_v17 = vld [vmem:[#allocation6 + $0x328] sm:$0xff] }
 0x122   :  { %557 = vmatprep.subr.mxu0 %v1177_v0 }
 0x123   :  { %558 = vmatpush1.msra.mxu0 %v537_v18  ;;  %v1314_v18 = vld [vmem:[#allocation6 + $0x320] sm:$0xff] }
 0x124   :  { %559 = vmatprep.subr.mxu0 %v1177_v0 }
 0x125   :  { %560 = vmatpush1.msra.mxu0 %v536_v19  ;;  %v81_v19 = vmul.f32 %v1312_v17, %v1312_v17 }
 0x126   :  { %561 = vmatprep.subr.mxu0 %v1177_v0 }
 0x127   :  { %562 = vmatpush1.msra.mxu0 %v535_v20  ;;  %110 = vadd.xlane.f32.xlu1 %v81_v19  ;;  %v80_v20 = vmul.f32 %v1314_v18, %v1314_v18 }
 0x128   :  { %563 = vmatprep.subr.mxu0 %v1177_v0 }
 0x129   :  { %564 = vmatpush1.msra.mxu0 %v534_v21  ;;  %v1320_v21 = vld [vmem:[#allocation6 + $0x310] sm:$0xff] }
 0x12a   :  { %565 = vmatprep.subr.mxu0 %v1177_v0 }
 0x12b   :  { %566 = vmatpush1.msra.mxu0 %v533_v22  ;;  %108 = vadd.xlane.f32.xlu1 %v80_v20  ;;  %v78_v22 = vmul.f32 %v1320_v21, %v1320_v21 }
 0x12c   :  { %567 = vmatprep.subr.mxu0 %v1177_v0 }
 0x12d   :  { %568 = vmatpush1.msra.mxu0 %v532_v23  ;;  %v1324_v23 = vld [vmem:[#allocation6 + $0x300] sm:$0xff] }
 0x12e   :  { %569 = vmatprep.subr.mxu0 %v1177_v0 }
 0x12f   :  { %570 = vmatpush1.msra.mxu0 %v531_v24  ;;  %104 = vadd.xlane.f32.xlu1 %v78_v22  ;;  %v76_v24 = vmul.f32 %v1324_v23, %v1324_v23 }
 0x130   :  { %571 = vmatprep.subr.mxu0 %v1177_v0 }
 0x131   :  { %572 = vmatpush1.msra.mxu0 %v530_v25  ;;  %v1328_v25 = vld [vmem:[#allocation6 + $0x2f0] sm:$0xff] }
 0x132   :  { %573 = vmatprep.subr.mxu0 %v1177_v0 }
 0x133   :  { %574 = vmatpush1.msra.mxu0 %v529_v26  ;;  %100 = vadd.xlane.f32.xlu1 %v76_v24 }
 0x134   :  { %575 = vmatprep.subr.mxu0 %v1177_v0 }
 0x135   :  { %576 = vmatpush1.msra.mxu0 %v528_v27  ;;  %v74_v27 = vmul.f32 %v1328_v25, %v1328_v25 }
 0x136   :  { %577 = vmatprep.subr.mxu0 %v1177_v0 }
 0x137   :  { %578 = vmatpush1.msra.mxu0 %v527_v28  ;;  %96 = vadd.xlane.f32.xlu1 %v74_v27 }
 0x138   :  { %579 = vmatprep.subr.mxu0 %v1177_v0 }
 0x139   :  { %580 = vmatpush1.msra.mxu0 %v526_v29 }
 0x13a   :  { %581 = vmatprep.subr.mxu0 %v1177_v0 }
 0x13b   :  { %582 = vmatpush1.msra.mxu0 %v525_v30  ;;  %v1332_v30 = vld [vmem:[#allocation6 + $0x2e0] sm:$0xff] }
 0x13c   :  { %583 = vmatprep.subr.mxu0 %v1177_v0 }
 0x13d   :  { %584 = vmatpush1.msra.mxu0 %v524_v31 }
 0x13e   :  { %585 = vmatprep.subr.mxu0 %v1177_v0 }
 0x13f   :  { %586 = vmatpush1.msra.mxu0 %v523_v32  ;;  %v72_v32 = vmul.f32 %v1332_v30, %v1332_v30 }
 0x140   :  { %603 = vmatprep.subr.mxu0 %v1177_v0 }
 0x141   :  { %604 = vmatpush2.msra.mxu0 %v546_v33  ;;  %v1336_v33 = vld [vmem:[#allocation6 + $0x2d0] sm:$0xff]  ;;  %92 = vadd.xlane.f32.xlu1 %v72_v32 }
 0x142   :  { %605 = vmatprep.subr.mxu0 %v1177_v0 }
 0x143   :  { %606 = vmatpush2.msra.mxu0 %v545_v34  ;;  %v70_v34 = vmul.f32 %v1336_v33, %v1336_v33 }
 0x144   :  { %607 = vmatprep.subr.mxu0 %v1177_v0 }
 0x145   :  { %608 = vmatpush2.msra.mxu0 %v544_v35  ;;  %v1340_v35 = vld [vmem:[#allocation6 + $0x2c0] sm:$0xff]  ;;  %88 = vadd.xlane.f32.xlu1 %v70_v34 }
 0x146   :  { %609 = vmatprep.subr.mxu0 %v1177_v0 }
 0x147   :  { %610 = vmatpush2.msra.mxu0 %v543_v36  ;;  %v68_v36 = vmul.f32 %v1340_v35, %v1340_v35 }
 0x148   :  { %611 = vmatprep.subr.mxu0 %v1177_v0 }
 0x149   :  { %612 = vmatpush2.msra.mxu0 %v542_v37  ;;  %84 = vadd.xlane.f32.xlu1 %v68_v36  ;;  %v115_v37 = vpop.xlane.xlu0 %114 }
 0x14a   :  { %613 = vmatprep.subr.mxu0 %v1177_v0  ;;  %vm223_vm2 = vcmp.eq.f32.partialorder %v115_v37, inf  ;;  %v226_v45 = vand.u32 2147483648, %v115_v37  ;;  %vm225_vm4 = vcmp.eq.f32.partialorder %v115_v37, 0.0 }
 0x14b   :  { %614 = vmatpush2.msra.mxu0 %v541_v38 }
 0x14c   :  { %615 = vmatprep.subr.mxu0 %v1177_v0 }
 0x14d   :  { %616 = vmatpush2.msra.mxu0 %v540_v39  ;;  %v113_v38 = vpop.xlane.xlu0 %112 }
 0x14e   :  { %617 = vmatprep.subr.mxu0 %v1177_v0  ;;  %vm216_vm3 = vcmp.eq.f32.partialorder %v113_v38, inf  ;;  %v219_v48 = vand.u32 2147483648, %v113_v38  ;;  %vm218_vm5 = vcmp.eq.f32.partialorder %v113_v38, 0.0 }
 0x14f   :  { %618 = vmatpush2.msra.mxu0 %v539_v40 }
 0x150   :  { %620 = vmatmul.mubr.f32.vlgmr.msra.gmra.mxu0 %v521_v41 }
 0x151   :  { %v1344_v40 = vpop.xlane.xlu0 %106 }
 0x152   :  { %vm195_vm8 = vcmp.eq.f32.partialorder %v1344_v40, inf  ;;  %vm197_vm9 = vcmp.eq.f32.partialorder %v1344_v40, 0.0 }
 0x155   :  { %v1346_v46 = vpop.xlane.xlu0 %102 }
 0x156   :  { %vm181_vm12 = vcmp.eq.f32.partialorder %v1346_v46, inf  ;;  %vm183_vm15 = vcmp.eq.f32.partialorder %v1346_v46, 0.0 }
 0x159   :  { %v1348_v54 = vpop.xlane.xlu0 %98 }
 0x15d   :  { %v1350_v60 = vpop.xlane.xlu0 %94 }
 0x161   :  { %v1352_v62 = vpop.xlane.xlu0 %90 }
 0x165   :  { %v1354_v2 = vpop.xlane.xlu0 %86 }
 0x1e0   :  { %v504_v8 = vpop.f32.mrf.mxu0 }
 0x1e1   :  { %v1306_v9 = vadd.f32 %v504_v8, %v437_v7 }
 0x1e2   :  { %v946_v10 = vpop.f32.mrf.mxu0 }
 0x1e3   :  { %v508_v11 = vmul.f32 %v1306_v9, %v1306_v9 }
 0x1e5   :  { %509 = vadd.xlane.f32.xlu0 %v508_v11 }
 0x210   :  { %v621_v14 = vpop.f32.mrf.mxu0 }
 0x211   :  { %v622_v15 = vadd.f32 %v621_v14, %v550_v13 }
 0x212   :  { %v623_v0 = vpop.f32.mrf.mxu0 }
 0x213   :  { %v626_v16 = vmul.f32 0.70710677, %v622_v15  ;;  %v625_v28 = vmul.f32 0.5, %v622_v15 }
 0x215   :  { %1026 = verf.f32 %v626_v16 }
 0x216   :  { %1028 = vrsqrt.f32 %v115_v37 }
 0x217   :  { %1030 = vrsqrt.f32 %v113_v38 }
 0x222   :  { %v1027_v26 = vpop.eup %1026 }
 0x223   :  { %v628_v29 = vadd.f32 1.0, %v1027_v26  ;;  %v1029_v39 = vpop.eup %1028 }
 0x224   :  { %v1031_v41 = vpop.eup %1030  ;;  %v222_v43 = vmul.f32 %v1029_v39, %v115_v37 }
 0x225   :  { %v629_v31 = vmul.f32 %v628_v29, %v625_v28  ;;  %v215_v44 = vmul.f32 %v1031_v41, %v113_v38 }
 0x226   :  { %v224_v47 = vsel %vm223_vm2, %v115_v37, %v222_v43  ;;  %vm167_vm2 = vcmp.eq.f32.partialorder %v1348_v54, inf }
 0x227   :  { %980 = vmatmul.mubr.f32.vlgmr.msra.gmra.mxu1 %v629_v31  ;;  %v217_v49 = vsel %vm216_vm3, %v113_v38, %v215_v44  ;;  %v227_v50 = vsel %vm225_vm4, %v226_v45, %v224_v47  ;;  %v184_v45 = vand.u32 2147483648, %v1346_v46 }
 0x228   :  { %v220_v53 = vsel %vm218_vm5, %v219_v48, %v217_v49  ;;  %v243_v56 = vadd.f32 1e-08, %v227_v50  ;;  %vm169_vm5 = vcmp.eq.f32.partialorder %v1348_v54, 0.0 }
 0x229   :  { %v242_v58 = vadd.f32 1e-08, %v220_v53 }
 0x22a   :  { %1032 = vrcp.f32 %v243_v56 }
 0x22b   :  { %1034 = vrcp.f32 %v242_v58 }
 0x237   :  { %v1033_v1 = vpop.eup %1032 }
 0x238   :  { %v1035_v4 = vpop.eup %1034  ;;  %v275_v6 = vmul.f32 %v1033_v1, %v1228_v51 }
 0x239   :  { %v274_v7 = vmul.f32 %v1035_v4, %v1230_v52  ;;  %v111_v52 = vpop.xlane.xlu1 %110 }
 0x23a   :  { %982 = vmatprep.subr.mxu1 %v275_v6  ;;  %vm209_vm10 = vcmp.eq.f32.partialorder %v111_v52, inf  ;;  %v212_v29 = vand.u32 2147483648, %v111_v52  ;;  %vm211_vm11 = vcmp.eq.f32.partialorder %v111_v52, 0.0 }
 0x23b   :  { %983 = vmatpush3.xpose.msra.mxu1 %v275_v6 }
 0x23c   :  { %984 = vmatprep.subr.mxu1 %v274_v7 }
 0x23d   :  { %v109_v16 = vpop.xlane.xlu1 %108 }
 0x23e   :  { %vm202_vm13 = vcmp.eq.f32.partialorder %v109_v16, inf  ;;  %vm204_vm14 = vcmp.eq.f32.partialorder %v109_v16, 0.0 }
 0x23f   :  { %985 = vmatpush3.xpose.msra.mxu1 %v274_v7 }
 0x241   :  { %v105_v20 = vpop.xlane.xlu1 %104 }
 0x242   :  { %vm188_vm0 = vcmp.eq.f32.partialorder %v105_v20, inf  ;;  %v191_v58 = vand.u32 2147483648, %v105_v20  ;;  %vm190_vm1 = vcmp.eq.f32.partialorder %v105_v20, 0.0 }
 0x245   :  { %v1368_v24 = vpop.xlane.xlu1 %100 }
 0x246   :  { %vm174_vm3 = vcmp.eq.f32.partialorder %v1368_v24, inf  ;;  %vm176_vm4 = vcmp.eq.f32.partialorder %v1368_v24, 0.0 }
 0x249   :  { %v1374_v34 = vpop.xlane.xlu1 %96 }
 0x24d   :  { %v1380_v47 = vpop.xlane.xlu1 %92 }
 0x26e   :  { %v510_v8 = vpop.xlane.xlu0 %509 }
 0x26f   :  { %1036 = vrsqrt.f32 %v510_v8  ;;  %vm513_vm6 = vcmp.eq.f32.partialorder %v510_v8, inf  ;;  %v516_v12 = vand.u32 2147483648, %v510_v8  ;;  %vm515_vm7 = vcmp.eq.f32.partialorder %v510_v8, 0.0 }
 0x27c   :  { %v1037_v10 = vpop.eup %1036 }
 0x27d   :  { %v512_v11 = vmul.f32 %v1037_v10, %v510_v8 }
 0x27f   :  { %v514_v13 = vsel %vm513_vm6, %v510_v8, %v512_v11  ;;  %v177_v11 = vand.u32 2147483648, %v1368_v24  ;;  %vm160_vm6 = vcmp.eq.f32.partialorder %v1374_v34, inf }
 0x280   :  { %v517_v14 = vsel %vm515_vm7, %v516_v12, %v514_v13  ;;  %vm162_vm7 = vcmp.eq.f32.partialorder %v1374_v34, 0.0 }
 0x281   :  { %v518_v15 = vadd.f32 1e-08, %v517_v14 }
 0x283   :  { %1038 = vrcp.f32 %v518_v15  ;;  %v170_v15 = vand.u32 2147483648, %v1348_v54 }
 0x284   :  { %1040 = vrsqrt.f32 %v1344_v40 }
 0x285   :  { %1042 = vrsqrt.f32 %v1346_v46 }
 0x286   :  { %1044 = vrsqrt.f32 %v111_v52 }
 0x287   :  { %1046 = vrsqrt.f32 %v109_v16 }
 0x288   :  { %1048 = vrsqrt.f32 %v1348_v54 }
 0x289   :  { %1050 = vrsqrt.f32 %v105_v20 }
 0x28a   :  { %1052 = vrsqrt.f32 %v1368_v24 }
 0x28b   :  { %1054 = vrsqrt.f32 %v1350_v60 }
 0x28c   :  { %1056 = vrsqrt.f32 %v1374_v34 }
 0x290   :  { %v1039_v0 = vpop.eup %1038 }
 0x291   :  { %v520_v51 = vmul.f32 %v1039_v0, %v1306_v9  ;;  %v1041_v19 = vpop.eup %1040  ;;  %v198_v9 = vand.u32 2147483648, %v1344_v40 }
 0x292   :  { %v194_v22 = vmul.f32 %v1041_v19, %v1344_v40  ;;  %v1043_v26 = vpop.eup %1042 }
 0x293   :  { %1014 = vmatprep.mubr.f32.mxu1 %v520_v51  ;;  %812 = vst [vmem:[%s1466_s3] sm:$0xff] %v520_v51  ;;  %v1045_v28 = vpop.eup %1044  ;;  %v180_v36 = vmul.f32 %v1043_v26, %v1346_v46  ;;  %v163_v26 = vand.u32 2147483648, %v1374_v34 }
 0x294   :  { %v196_v27 = vsel %vm195_vm8, %v1344_v40, %v194_v22  ;;  %v208_v31 = vmul.f32 %v1045_v28, %v111_v52  ;;  %v1047_v38 = vpop.eup %1046  ;;  %v205_v40 = vand.u32 2147483648, %v109_v16  ;;  %vm153_vm8 = vcmp.eq.f32.partialorder %v1350_v60, inf }
 0x295   :  { %v199_v32 = vsel %vm197_vm9, %v198_v9, %v196_v27  ;;  %v201_v44 = vmul.f32 %v1047_v38, %v109_v16  ;;  %v1049_v48 = vpop.eup %1048  ;;  %v182_v49 = vsel %vm181_vm12, %v1346_v46, %v180_v36  ;;  %v156_v36 = vand.u32 2147483648, %v1350_v60 }
 0x296   :  { %v210_v37 = vsel %vm209_vm10, %v111_v52, %v208_v31  ;;  %v239_v41 = vadd.f32 1e-08, %v199_v32  ;;  %v1051_v53 = vpop.eup %1050  ;;  %v185_v6 = vsel %vm183_vm15, %v184_v45, %v182_v49  ;;  %v166_v7 = vmul.f32 %v1049_v48, %v1348_v54  ;;  %v89_v49 = vpop.xlane.xlu1 %88 }
 0x297   :  { %v213_v39 = vsel %vm211_vm11, %v212_v29, %v210_v37  ;;  %v203_v50 = vsel %vm202_vm13, %v109_v16, %v201_v44  ;;  %v187_v4 = vmul.f32 %v1051_v53, %v105_v20  ;;  %v1053_v10 = vpop.eup %1052  ;;  %v237_v12 = vadd.f32 1e-08, %v185_v6 }
 0x298   :  { %v241_v43 = vadd.f32 1e-08, %v213_v39  ;;  %v206_v56 = vsel %vm204_vm14, %v205_v40, %v203_v50  ;;  %v173_v14 = vmul.f32 %v1053_v10, %v1368_v24  ;;  %v1055_v0 = vpop.eup %1054  ;;  %v168_v51 = vsel %vm167_vm2, %v1348_v54, %v166_v7 }
 0x299   :  { %v240_v1 = vadd.f32 1e-08, %v206_v56  ;;  %v189_v8 = vsel %vm188_vm0, %v105_v20, %v187_v4  ;;  %v1057_v16 = vpop.eup %1056  ;;  %v171_v9 = vsel %vm169_vm5, %v170_v15, %v168_v51  ;;  %v152_v27 = vmul.f32 %v1055_v0, %v1350_v60 }
 0x29a   :  { %1058 = vrcp.f32 %v241_v43  ;;  %v192_v46 = vsel %vm190_vm1, %v191_v58, %v189_v8  ;;  %v175_v52 = vsel %vm174_vm3, %v1368_v24, %v173_v14  ;;  %v159_v22 = vmul.f32 %v1057_v16, %v1374_v34  ;;  %v1417_v58 = vpop.xlane.xlu1 %84 }
 0x29b   :  { %1060 = vrsqrt.f32 %v1380_v47  ;;  %v238_v13 = vadd.f32 1e-08, %v192_v46  ;;  %v178_v19 = vsel %vm176_vm4, %v177_v11, %v175_v52  ;;  %v235_v29 = vadd.f32 1e-08, %v171_v9 }
 0x29c   :  { %1062 = vrcp.f32 %v239_v41  ;;  %v236_v20 = vadd.f32 1e-08, %v178_v19  ;;  %v161_v28 = vsel %vm160_vm6, %v1374_v34, %v159_v22  ;;  %v154_v38 = vsel %vm153_vm8, %v1350_v60, %v152_v27 }
 0x29d   :  { %1064 = vrcp.f32 %v240_v1  ;;  %v164_v37 = vsel %vm162_vm7, %v163_v26, %v161_v28  ;;  %vm155_vm9 = vcmp.eq.f32.partialorder %v1350_v60, 0.0  ;;  %vm146_vm10 = vcmp.eq.f32.partialorder %v1380_v47, inf }
 0x29e   :  { %1066 = vrcp.f32 %v238_v13  ;;  %v234_v40 = vadd.f32 1e-08, %v164_v37  ;;  %v157_v43 = vsel %vm155_vm9, %v156_v36, %v154_v38  ;;  %v149_v44 = vand.u32 2147483648, %v1380_v47 }
 0x29f   :  { %1068 = vrcp.f32 %v237_v12  ;;  %vm148_vm11 = vcmp.eq.f32.partialorder %v1380_v47, 0.0  ;;  %v233_v48 = vadd.f32 1e-08, %v157_v43  ;;  %vm139_vm12 = vcmp.eq.f32.partialorder %v1352_v62, inf }
 0x2a0   :  { %1070 = vrcp.f32 %v236_v20  ;;  %vm141_vm13 = vcmp.eq.f32.partialorder %v1352_v62, 0.0  ;;  %vm132_vm14 = vcmp.eq.f32.partialorder %v89_v49, inf  ;;  %v648_v0 = vsub.s32 3, %v1256_v3 }
 0x2a1   :  { %1072 = vrcp.f32 %v235_v29  ;;  %v135_v51 = vand.u32 2147483648, %v89_v49  ;;  %vm134_vm15 = vcmp.eq.f32.partialorder %v89_v49, 0.0  ;;  %vm125_vm0 = vcmp.eq.f32.partialorder %v1354_v2, inf }
 0x2a2   :  { %1074 = vrsqrt.f32 %v1352_v62  ;;  %v128_v20 = vand.u32 2147483648, %v1354_v2  ;;  %vm127_vm1 = vcmp.eq.f32.partialorder %v1354_v2, 0.0  ;;  %vm118_vm2 = vcmp.eq.f32.partialorder %v1417_v58, inf }
 0x2a3   :  { %1076 = vrcp.f32 %v234_v40  ;;  %vm120_vm3 = vcmp.eq.f32.partialorder %v1417_v58, 0.0 }
 0x2a4   :  { %1078 = vrsqrt.f32 %v89_v49 }
 0x2a5   :  { %1080 = vrcp.f32 %v233_v48 }
 0x2a6   :  { %1082 = vrsqrt.f32 %v1354_v2 }
 0x2a7   :  { %v1059_v54 = vpop.eup %1058 }
 0x2a8   :  { %v1061_v24 = vpop.eup %1060  ;;  %v273_v31 = vmul.f32 %v1059_v54, %v1312_v17 }
 0x2a9   :  { %v1063_v32 = vpop.eup %1062  ;;  %v145_v39 = vmul.f32 %v1061_v24, %v1380_v47  ;;  %v121_v24 = vand.u32 2147483648, %v1417_v58 }
 0x2aa   :  { %986 = vmatprep.subr.mxu1 %v273_v31  ;;  %v1065_v34 = vpop.eup %1064  ;;  %v271_v17 = vmul.f32 %v1063_v32, %v1236_v55 }
 0x2ab   :  { %987 = vmatpush3.xpose.msra.mxu1 %v273_v31  ;;  %v272_v41 = vmul.f32 %v1065_v34, %v1314_v18  ;;  %v147_v45 = vsel %vm146_vm10, %v1380_v47, %v145_v39  ;;  %v1067_v60 = vpop.eup %1066 }
 0x2ac   :  { %v270_v18 = vmul.f32 %v1067_v60, %v1320_v21  ;;  %v1069_v50 = vpop.eup %1068  ;;  %v150_v55 = vsel %vm148_vm11, %v149_v44, %v147_v45  ;;  %v276_v45 = vld [vmem:[#allocation6 + $0x340] sm:$0xff]  ;;  %v277_v60 = vld [vmem:[#allocation6 + $0x348] sm:$0xff] }
 0x2ad   :  { %988 = vmatprep.subr.mxu1 %v272_v41  ;;  %v232_v53 = vadd.f32 1e-08, %v150_v55  ;;  %v269_v47 = vmul.f32 %v1069_v50, %v1240_v57  ;;  %v1071_v56 = vpop.eup %1070  ;;  %v279_v48 = vmul.f32 %v277_v60, %v277_v60 }
 0x2ae   :  { %v268_v1 = vmul.f32 %v1071_v56, %v1324_v23  ;;  %v1073_v21 = vpop.eup %1072  ;;  %v142_v23 = vand.u32 2147483648, %v1352_v62 }
 0x2af   :  { %989 = vmatpush3.xpose.msra.mxu1 %v272_v41  ;;  %1084 = vrcp.f32 %v232_v53  ;;  %v1075_v4 = vpop.eup %1074  ;;  %v267_v6 = vmul.f32 %v1073_v21, %v1244_v59 }
 0x2b0   :  { %990 = vmatprep.subr.mxu1 %v271_v17  ;;  %1086 = vrsqrt.f32 %v1417_v58  ;;  %v1077_v7 = vpop.eup %1076  ;;  %v138_v57 = vmul.f32 %v1075_v4, %v1352_v62 }
 0x2b1   :  { %v1079_v8 = vpop.eup %1078  ;;  %v266_v10 = vmul.f32 %v1077_v7, %v1328_v25 }
 0x2b2   :  { %v1081_v46 = vpop.eup %1080  ;;  %v140_v11 = vsel %vm139_vm12, %v1352_v62, %v138_v57  ;;  %v131_v12 = vmul.f32 %v1079_v8, %v89_v49 }
 0x2b3   :  { %991 = vmatpush3.xpose.msra.mxu1 %v271_v17  ;;  %v1083_v59 = vpop.eup %1082  ;;  %v265_v13 = vmul.f32 %v1081_v46, %v1248_v61  ;;  %v143_v15 = vsel %vm141_vm13, %v142_v23, %v140_v11  ;;  %v649_v61 = vrot.slane %v1259_v5, %v648_v0  ;;  %v735_v0 = vsub.s32 4, %v1256_v3 }
 0x2b4   :  { %992 = vmatprep.subr.mxu1 %v270_v18  ;;  %v124_v25 = vmul.f32 %v1083_v59, %v1354_v2  ;;  %v133_v52 = vsel %vm132_vm14, %v89_v49, %v131_v12  ;;  %v231_v19 = vadd.f32 1e-08, %v143_v15 }
 0x2b5   :  { %v136_v22 = vsel %vm134_vm15, %v135_v51, %v133_v52  ;;  %v736_v51 = vrot.slane %v1259_v5, %v735_v0 }
 0x2b6   :  { %v126_v9 = vsel %vm125_vm0, %v1354_v2, %v124_v25  ;;  %1088 = vrcp.f32 %v231_v19  ;;  %v230_v28 = vadd.f32 1e-08, %v136_v22 }
 0x2b7   :  { %993 = vmatpush3.xpose.msra.mxu1 %v270_v18 }
 0x2b8   :  { %994 = vmatprep.subr.mxu1 %v269_v47  ;;  %1090 = vrcp.f32 %v230_v28 }
 0x2bb   :  { %995 = vmatpush3.xpose.msra.mxu1 %v269_v47 }
 0x2bc   :  { %996 = vmatprep.subr.mxu1 %v268_v1  ;;  %v1085_v14 = vpop.eup %1084 }
 0x2bd   :  { %v1087_v16 = vpop.eup %1086  ;;  %v264_v62 = vmul.f32 %v1085_v14, %v1332_v30  ;;  %v129_v30 = vsel %vm127_vm1, %v128_v20, %v126_v9 }
 0x2be   :  { %v117_v26 = vmul.f32 %v1087_v16, %v1417_v58  ;;  %v229_v32 = vadd.f32 1e-08, %v129_v30 }
 0x2bf   :  { %997 = vmatpush3.xpose.msra.mxu1 %v268_v1 }
 0x2c0   :  { %998 = vmatprep.subr.mxu1 %v267_v6  ;;  %v119_v31 = vsel %vm118_vm2, %v1417_v58, %v117_v26  ;;  %1092 = vrcp.f32 %v229_v32 }
 0x2c1   :  { %v122_v36 = vsel %vm120_vm3, %v121_v24, %v119_v31 }
 0x2c2   :  { %v228_v37 = vadd.f32 1e-08, %v122_v36 }
 0x2c3   :  { %999 = vmatpush3.xpose.msra.mxu1 %v267_v6  ;;  %v1089_v38 = vpop.eup %1088 }
 0x2c4   :  { %1000 = vmatprep.subr.mxu1 %v266_v10  ;;  %1094 = vrcp.f32 %v228_v37  ;;  %v263_v39 = vmul.f32 %v1089_v38, %v1252_v63  ;;  %v278_v63 = vmul.f32 %v276_v45, %v276_v45 }
 0x2c5   :  { %v1091_v34 = vpop.eup %1090 }
 0x2c6   :  { %v262_v40 = vmul.f32 %v1091_v34, %v1336_v33  ;;  %280 = vadd.xlane.f32.xlu0 %v278_v63 }
 0x2c7   :  { %1001 = vmatpush3.xpose.msra.mxu1 %v266_v10 }
 0x2c8   :  { %1002 = vmatprep.subr.mxu1 %v265_v13 }
 0x2cb   :  { %1003 = vmatpush3.xpose.msra.mxu1 %v265_v13 }
 0x2cc   :  { %1004 = vmatprep.subr.mxu1 %v264_v62 }
 0x2cd   :  { %v1093_v41 = vpop.eup %1092 }
 0x2ce   :  { %v261_v17 = vmul.f32 %v1093_v41, %v1285_v42 }
 0x2cf   :  { %1005 = vmatpush3.xpose.msra.mxu1 %v264_v62 }
 0x2d0   :  { %1006 = vmatprep.subr.mxu1 %v263_v39 }
 0x2d1   :  { %v1095_v43 = vpop.eup %1094 }
 0x2d2   :  { %v260_v44 = vmul.f32 %v1095_v43, %v1340_v35 }
 0x2d3   :  { %1007 = vmatpush3.xpose.msra.mxu1 %v263_v39 }
 0x2d4   :  { %1008 = vmatprep.subr.mxu1 %v262_v40 }
 0x2d7   :  { %1009 = vmatpush3.xpose.msra.mxu1 %v262_v40 }
 0x2d8   :  { %1010 = vmatprep.subr.mxu1 %v261_v17 }
 0x2db   :  { %1011 = vmatpush3.xpose.msra.mxu1 %v261_v17 }
 0x2dc   :  { %1012 = vmatprep.subr.mxu1 %v260_v44 }
 0x2df   :  { %1013 = vmatpush3.xpose.msra.mxu1 %v260_v44 }
 0x2e7   :  { %v716_v27 = vpop.f32.mrf.mxu1 }
 0x2e8   :  { %v717_v54 = vadd.f32 %v716_v27, %v649_v61 }
 0x2e9   :  { %v981_v29 = vpop.f32.mrf.mxu1 }
 0x2ea   :  { %v720_v2 = vmul.f32 %v717_v54, %v717_v54 }
 0x2ec   :  { %721 = vadd.xlane.f32.xlu1 %v720_v2 }
 0x2f0   :  { %282 = vadd.xlane.f32.xlu1 %v279_v48 }
 0x34f   :  { %v281_v56 = vpop.xlane.xlu0 %280 }
 0x350   :  { %vm286_vm6 = vcmp.eq.f32.partialorder %v281_v56, inf  ;;  %v289_v21 = vand.u32 2147483648, %v281_v56  ;;  %vm288_vm7 = vcmp.eq.f32.partialorder %v281_v56, 0.0 }
 0x375   :  { %v722_v49 = vpop.xlane.xlu1 %721 }
 0x376   :  { %1096 = vrsqrt.f32 %v722_v49  ;;  %vm725_vm4 = vcmp.eq.f32.partialorder %v722_v49, inf  ;;  %v728_v50 = vand.u32 2147483648, %v722_v49  ;;  %vm727_vm5 = vcmp.eq.f32.partialorder %v722_v49, 0.0 }
 0x379   :  { %v283_v58 = vpop.xlane.xlu1 %282 }
 0x37a   :  { %vm293_vm8 = vcmp.eq.f32.partialorder %v283_v58, inf  ;;  %v296_v7 = vand.u32 2147483648, %v283_v58  ;;  %vm295_vm9 = vcmp.eq.f32.partialorder %v283_v58, 0.0 }
 0x383   :  { %v1097_v33 = vpop.eup %1096 }
 0x384   :  { %v724_v18 = vmul.f32 %v1097_v33, %v722_v49 }
 0x386   :  { %v726_v42 = vsel %vm725_vm4, %v722_v49, %v724_v18 }
 0x387   :  { %v729_v55 = vsel %vm727_vm5, %v728_v50, %v726_v42 }
 0x388   :  { %v730_v53 = vadd.f32 1e-08, %v729_v55 }
 0x38a   :  { %1098 = vrcp.f32 %v730_v53 }
 0x38b   :  { %1100 = vrsqrt.f32 %v281_v56 }
 0x38c   :  { %1102 = vrsqrt.f32 %v283_v58 }
 0x397   :  { %v1099_v35 = vpop.eup %1098 }
 0x398   :  { %v732_v47 = vmul.f32 %v1099_v35, %v717_v54  ;;  %v1101_v1 = vpop.eup %1100 }
 0x399   :  { %v1103_v4 = vpop.eup %1102  ;;  %v285_v6 = vmul.f32 %v1101_v1, %v281_v56 }
 0x39a   :  { %1015 = vmatmul.mubr.f32.vlgmr.msra.gmra.mxu1 %v732_v47  ;;  %813 = vst [vmem:[%s1466_s3 + $0x8] sm:$0xff] %v732_v47  ;;  %v292_v57 = vmul.f32 %v1103_v4, %v283_v58 }
 0x39b   :  { %v287_v8 = vsel %vm286_vm6, %v281_v56, %v285_v6 }
 0x39c   :  { %v290_v10 = vsel %vm288_vm7, %v289_v21, %v287_v8  ;;  %v294_v46 = vsel %vm293_vm8, %v283_v58, %v292_v57 }
 0x39d   :  { %v298_v23 = vadd.f32 1e-08, %v290_v10  ;;  %v297_v11 = vsel %vm295_vm9, %v296_v7, %v294_v46 }
 0x39e   :  { %v299_v12 = vadd.f32 1e-08, %v297_v11 }
 0x39f   :  { %1104 = vrcp.f32 %v298_v23 }
 0x3a0   :  { %1106 = vrcp.f32 %v299_v12 }
 0x3ac   :  { %v1105_v59 = vpop.eup %1104 }
 0x3ad   :  { %v1107_v13 = vpop.eup %1106  ;;  %v302_v14 = vmul.f32 %v1105_v59, %v276_v45 }
 0x3ae   :  { %v303_v15 = vmul.f32 %v1107_v13, %v277_v60 }
 0x3af   :  { %814 = vst [vmem:[%s1466_s3 + $0x10] sm:$0xff] %v302_v14 }
 0x3b0   :  { %815 = vst [vmem:[%s1466_s3 + $0x18] sm:$0xff] %v303_v15 }
 0x45a   :  { %v1016_v25 = vpop.f32.mrf.mxu1 }
 0x45b   :  { %v809_v52 = vadd.f32 %v1016_v25, %v736_v51 }
 0x45c   :  { %v803_v16 = vpop.f32.mrf.mxu1 }
 0x45d   :  { %817 = vst [vmem:[%s1466_s3 + $0x28] sm:$0xff] %v809_v52  ;;  %v804_v62 = vadd.f32 %v803_v16, %v736_v51 }
 0x45f   :  { %816 = vst [vmem:[%s1466_s3 + $0x20] sm:$0xff] %v804_v62 }
 0x460   :  { %822 = vsyncpa [#allocation3], 1 }
 0x461   :  { %823 = vsyncpa [#allocation5], 1 }

</bundles_post_ra>
